<compile_context>
chip_gen: v7x
topology: tpu7x:2x2x1
jax: 0.10.0
libtpu: 0.0.40
codegen_flags: <defaults>
</compile_context>

<pallas_src>
import functools

import jax
import jax.numpy as jnp
from jax.experimental import pallas as pl
from jax.experimental.pallas import tpu as pltpu


def _tv_kernel(x_ref, out_ref, *, w):
    # x_ref: (tbc, H*W) lane-dense block of fused (batch*channel) slices.
    # out_ref: (2, H*W) per-block partial sums (row 0: H-diff, row 1: W-diff).
    x = x_ref[...]
    # Neighbour differences via XLU lane rolls; wrap lanes masked post-reduce
    # in the wrapper (per-lane mask, identical for every block).
    dw = (x - pltpu.roll(x, shift=1, axis=1)).astype(jnp.float32)
    dh = (x - pltpu.roll(x, shift=w, axis=1)).astype(jnp.float32)
    out_ref[0:1, :] = jnp.sum(dh * dh, axis=0, keepdims=True)
    out_ref[1:2, :] = jnp.sum(dw * dw, axis=0, keepdims=True)


def _divisors(n):
    divs = set()
    d = 1
    while d * d <= n:
        if n % d == 0:
            divs.add(d)
            divs.add(n // d)
        d += 1
    return sorted(divs)


def _choose_tbc(bc, hw, itemsize, target_bytes, hard_cap_bytes):
    """Largest divisor of bc whose (8,128)-padded VMEM block fits the budget."""
    lanes_pad = ((hw + 127) // 128) * 128

    def padded_block_bytes(t):
        rows_pad = ((t + 7) // 8) * 8      # sublane padding
        return rows_pad * lanes_pad * itemsize

    divs = _divisors(bc)
    # Prefer >= 2 grid steps so the parallel grid axis can shard across both
    # v7x TensorCores (no effect on v5e/v6e).
    cands = [t for t in divs if t < bc] or divs
    for budget in (target_bytes, hard_cap_bytes):
        fitting = [t for t in cands if padded_block_bytes(t) <= budget]
        if fitting:
            return max(fitting)
    return None


def _tv_loss_jax(x, weight):
    # Plain-JAX path for feature maps too large for a single lane-dense block.
    B, C, H, W = x.shape
    h_tv = jnp.sum(jnp.square((x[:, :, 1:, :] - x[:, :, :-1, :]).astype(jnp.float32)))
    w_tv = jnp.sum(jnp.square((x[:, :, :, 1:] - x[:, :, :, :-1]).astype(jnp.float32)))
    count_h = C * (H - 1) * W
    count_w = C * H * (W - 1)
    return weight * (h_tv / count_h + w_tv / count_w) / B


def tv_loss(x: jax.Array, weight: float = 1.0) -> jax.Array:
    """Pallas implementation of TVLoss.forward for NCHW input x."""
    B, C, H, W = x.shape
    BC = B * C
    HW = H * W
    itemsize = jnp.dtype(x.dtype).itemsize

    tbc = _choose_tbc(BC, HW, itemsize,
                      target_bytes=8 * 1024 * 1024,
                      hard_cap_bytes=16 * 1024 * 1024)
    if tbc is None:
        # TODO(synk): add an H-tiled Pallas path (1-row halo blocks) for single
        # feature maps too large to fit one lane-dense VMEM block.
        return _tv_loss_jax(x, weight)

    num_blocks = BC // tbc
    # Metadata-only reshape of a contiguous array: no extra HBM traffic. With
    # the last two dims exactly (tbc, HW), every block equals the full trailing
    # dims, so any divisor tbc is a legal block shape.
    x_flat = x.reshape(num_blocks, tbc, HW)

    out_bytes = num_blocks * 2 * HW * 4
    parts = pl.pallas_call(
        functools.partial(_tv_kernel, w=W),
        out_shape=jax.ShapeDtypeStruct((num_blocks, 2, HW), jnp.float32),
        grid_spec=pltpu.PrefetchScalarGridSpec(
            num_scalar_prefetch=0,
            grid=(num_blocks,),
            in_specs=[pl.BlockSpec((None, tbc, HW), lambda i: (i, 0, 0))],
            out_specs=pl.BlockSpec((None, 2, HW), lambda i: (i, 0, 0)),
        ),
        compiler_params=pltpu.CompilerParams(
            # Per-block independent outputs -> grid axis can be sharded across
            # TensorCores on v7x.
            dimension_semantics=("parallel",),
            vmem_limit_bytes=48 * 1024 * 1024,
        ),
        cost_estimate=pl.CostEstimate(
            flops=6 * x.size,
            transcendentals=0,
            bytes_accessed=x.size * itemsize + out_bytes,
        ),
    )(x_flat)

    # Tiny final reduction in JAX: mask the fixed per-lane wrap terms once.
    lane = jnp.arange(HW, dtype=jnp.int32)
    h_tv = jnp.sum(jnp.where(lane >= W, parts[:, 0, :], 0.0))
    w_tv = jnp.sum(jnp.where((lane % W) >= 1, parts[:, 1, :], 0.0))

    # NOTE: matches the PyTorch module exactly, including the divide-by-zero
    # (inf/nan) behavior when H == 1 or W == 1.
    count_h = C * (H - 1) * W
    count_w = C * H * (W - 1)
    return weight * (h_tv / count_h + w_tv / count_w) / B


if __name__ == "__main__":
    key = jax.random.PRNGKey(0)
    x = jax.random.normal(key, (2, 4, 16, 16), dtype=jnp.float32)

    out = tv_loss(x, weight=1.0)
    jax.block_until_ready(out)

    # Pure-JAX reference (same semantics as the PyTorch module).
    B, C, H, W = x.shape
    h_tv_ref = jnp.sum((x[:, :, 1:, :] - x[:, :, :-1, :]) ** 2)
    w_tv_ref = jnp.sum((x[:, :, :, 1:] - x[:, :, :, :-1]) ** 2)
    ref = 1.0 * (h_tv_ref / (C * (H - 1) * W) + w_tv_ref / (C * H * (W - 1))) / B
    assert jnp.allclose(out, ref, rtol=1e-5, atol=1e-6), (out, ref)

    print("KERNEL_OK")
</pallas_src>

<mosaic_0001>
module attributes {stable_mosaic.version = 11 : i64} {
  func.func @_tv_kernel(%arg0: i32, %arg1: memref<1x4x256xf32, #tpu.memory_space<vmem>>, %arg2: memref<1x2x256xf32, #tpu.memory_space<vmem>>) attributes {dimension_semantics = [#tpu.dimension_semantics<parallel>], iteration_bounds = array<i64: 2>, scalar_prefetch = 0 : i64, scratch_operands = 0 : i64, tpu.core_type = #tpu.core_type<tc>, window_params = [{transform_indices = @transform_0, window_bounds = array<i64: 1, 4, 256>}, {transform_indices = @transform_1, window_bounds = array<i64: 1, 2, 256>}]} {
    %c0 = arith.constant 0 : index
    %c0_0 = arith.constant 0 : index
    %c0_1 = arith.constant 0 : index
    %0 = vector.load %arg1[%c0, %c0_0, %c0_1] : memref<1x4x256xf32, #tpu.memory_space<vmem>>, vector<1x4x256xf32>
    %1 = vector.shape_cast %0 : vector<1x4x256xf32> to vector<4x256xf32>
    %c1_i32 = arith.constant 1 : i32
    %2 = tpu.dynamic_rotate %1 by %c1_i32 dim 1 : vector<4x256xf32>, i32 -> vector<4x256xf32>
    %3 = arith.subf %1, %2 : vector<4x256xf32>
    %c16_i32 = arith.constant 16 : i32
    %4 = tpu.dynamic_rotate %1 by %c16_i32 dim 1 : vector<4x256xf32>, i32 -> vector<4x256xf32>
    %5 = arith.subf %1, %4 : vector<4x256xf32>
    %6 = arith.mulf %5, %5 : vector<4x256xf32>
    %cst = arith.constant dense<0.000000e+00> : vector<256xf32>
    %7 = vector.multi_reduction <add>, %6, %cst [0] : vector<4x256xf32> to vector<256xf32>
    %8 = vector.shape_cast %7 : vector<256xf32> to vector<1x256xf32>
    %c0_2 = arith.constant 0 : index
    %c0_3 = arith.constant 0 : index
    %c0_4 = arith.constant 0 : index
    %9 = vector.load %arg2[%c0_2, %c0_3, %c0_4] : memref<1x2x256xf32, #tpu.memory_space<vmem>>, vector<1x1x256xf32>
    %10 = vector.shape_cast %9 : vector<1x1x256xf32> to vector<1x256xf32>
    %11 = vector.shape_cast %8 : vector<1x256xf32> to vector<1x1x256xf32>
    tpu.vector_store %arg2[%c0_2, %c0_3, %c0_4], %11 {strides = array<i32>} : memref<1x2x256xf32, #tpu.memory_space<vmem>>, vector<1x1x256xf32>,
    %12 = arith.mulf %3, %3 : vector<4x256xf32>
    %cst_5 = arith.constant dense<0.000000e+00> : vector<256xf32>
    %13 = vector.multi_reduction <add>, %12, %cst_5 [0] : vector<4x256xf32> to vector<256xf32>
    %14 = vector.shape_cast %13 : vector<256xf32> to vector<1x256xf32>
    %c0_6 = arith.constant 0 : index
    %c1 = arith.constant 1 : index
    %c0_7 = arith.constant 0 : index
    %15 = vector.load %arg2[%c0_6, %c1, %c0_7] : memref<1x2x256xf32, #tpu.memory_space<vmem>>, vector<1x1x256xf32>
    %16 = vector.shape_cast %15 : vector<1x1x256xf32> to vector<1x256xf32>
    %17 = vector.shape_cast %14 : vector<1x256xf32> to vector<1x1x256xf32>
    tpu.vector_store %arg2[%c0_6, %c1, %c0_7], %17 {strides = array<i32>} : memref<1x2x256xf32, #tpu.memory_space<vmem>>, vector<1x1x256xf32>,
    return
  }
  func.func @transform_0(%arg0: i32) -> (i32, i32, i32) {
    %c0_i32 = arith.constant 0 : i32
    %c0_i32_0 = arith.constant 0 : i32
    %c0_i32_1 = arith.constant 0 : i32
    return %arg0, %c0_i32, %c0_i32_0 : i32, i32, i32
  }
  func.func @transform_1(%arg0: i32) -> (i32, i32, i32) {
    %c0_i32 = arith.constant 0 : i32
    %c0_i32_0 = arith.constant 0 : i32
    %c0_i32_1 = arith.constant 0 : i32
    return %arg0, %c0_i32, %c0_i32_0 : i32, i32, i32
  }
}

</mosaic_0001>

<bundles_post_ra>
// kernel: tpu_custom_call.1
= control target key start
LH: loop header
LB: loop body
LE: loop exit
PB: predicated region body
PF: predicated region fallthrough
CT: control target
= control target key end

     0   :  { %6 = vsyncpa [#allocation3], 0  ;;  %s670_s0 = inlined_call_operand.hbm [shape: f32[2,4,256], index: 0, kind: input, shape index: {}]   ;;  %s671_s1 = inlined_call_operand.hbm [shape: f32[2,2,256], index: 1, kind: output, shape index: {}]  }
   0x1   :  { %8 = vsyncpa [#allocation3 + $0x1], 0 }
   0x2   :  { %9 = vsyncpa [#allocation4], 0 }
   0x3   :  { %11 = vsyncpa [#allocation4 + $0x1], 0  ;;  %s508_s6 = smov 0   ;;  %s510_s7 = smov 0  }
   0x4   :  { %s512_s8 = smov 0   ;;  %s514_s9 = smov 0  }
   0x5 LB: > { %s529_s10 = sadd.s32 4294967295, %s491_s9   ;;  %s328_s11 = sadd.s32 4294967294, %s491_s9   ;;  %s491_s9 = sphi %s514_s9, %s686_s9   ;;  %s487_s8 = sphi %s512_s8, %s685_s8   ;;  %s483_s7 = sphi %s510_s7, %s684_s7   ;;  %s479_s6 = sphi %s508_s6, %s683_s6  }
   0x6   : > { %s533_s12 = sadd.s32 1, %s491_s9   ;;  %s24_s13 = sadd.s32 1, %s487_s8 }
   0x7   : > { %s21_s14 = ssub.s32 %s491_s9, %s533_s12  ;;  %p31_p0 = scmp.ne.s32.totalorder %s487_s8, %s483_s7 }
   0x8   : > { %p22_p1 = scmp.eq.s32.totalorder %s21_s14, 0  ;;  %p32_p2 = scmp.eq.s32.totalorder %s491_s9, 0 }
   0x9   : > { %p37_p3 = scmp.ne.s32.totalorder %s483_s7, %s479_s6  ;;  %p38_p4 = scmp.eq.s32.totalorder %s529_s10, 0 }
   0xa   : > { %s545_s15 = scalar_select %p22_p1, %s487_s8, %s24_s13  }
   0xb   : > { %p547_p5 = por %p32_p2, %p31_p0  ;;  %p551_p6 = por %p38_p4, %p37_p3 }
   0xc   : > { %p61_p7 = scmp.eq.s32.totalorder %s529_s10, 1  ;;  %p67_p8 = scmp.eq.s32.totalorder %s328_s11, 1 }
   0xd   : > { %p357_p10 = scmp.lt.s32.totalorder %s491_s9, 2  ;;  %s87_s20 = sand.u32 1, %s487_s8  }
   0xe   : > { %p558_p11 = por %p61_p7, %p31_p0  ;;  %p562_p12 = por %p67_p8, %p37_p3 }
   0xf   : > { %s343_s21 = sshll.u32 %s491_s9, 7  ;;  %s331_s22 = sshll.u32 %s87_s20, 3 }
  0x10   : > { %s675_s18 = scalar_select %p558_p11, 1, 0 }
  0x11   : > { %s676_s19 = scalar_select %p562_p12, 1, 0 }
  0x12   : > { %s571_s25 = scalar_lea.hbm %s670_s0, %s343_s21  ;;  %s91_s26 = scalar_lea.vmem [#allocation2], %s331_s22 }
  0x13   : > { %s99_s27 = sshll.u32 %s91_s26, 4  ;;  %p575_p13 = pnand %p357_p10, %p547_p5  ;;  %s579_s27 = int_to_ptr.vmem [resolvable:$true] %s99_s27 }
  0x14   : > { %s88_s29 = scalar_lea.sflag [#allocation3], %s87_s20  ;;  %s395_s30 = scalar_lea.hbm %s571_s25, 128 }
  0x15   : > { %p396_p2 = scmp.ne.s32.totalorder %s571_s25, %s395_s30  ;;  %p397_p3 = pneg %p575_p13 }
  0x16   : > { %s400_s4 = scalar_lea.hbm %s670_s0, 256  ;;  %p401_p5 = scmp.lt.u32.totalorder %s571_s25, %s670_s0 }
  0x17   : > { %p398_p4 = pnand %p397_p3, %p396_p2  ;;  %p402_p8 = scmp.lt.u32.totalorder %s400_s4, %s395_s30 }
  0x18   : > { %p404_p9 = scmp.lt.u32.totalorder %s395_s30, %s571_s25 }
  0x19   : > { %p399_p7 = pneg %p398_p4  ;;  %p403_p10 = por %p402_p8, %p401_p5 }
  0x1b   : > { %p405_p0 = por %p404_p9, %p403_p10 }
  0x1d   : > { %p406_p1 = pnand %p405_p0, %p399_p7 }
  0x1f   : > { %409 = shalt.err (!%p406_p1)
}
  0x20   : > { %s410_s13 = scalar_lea.vmem %s579_s27, 128  ;;  %s493_s14 = smov [#allocation2]  }
  0x21   : > { %p411_p2 = scmp.ne.s32.totalorder %s579_s27, %s410_s13  ;;  %s415_s16 = sshll.u32 %s493_s14, 4  ;;  %s416_s16 = int_to_ptr.vmem [resolvable:$false] %s415_s16 }
  0x22   : > { %s417_s20 = scalar_lea.vmem %s416_s16, 256  ;;  %p418_p11 = scmp.lt.s32.totalorder %s579_s27, %s416_s16 }
  0x23   : > { %p413_p4 = pnand %p411_p2, %p397_p3  ;;  %p419_p5 = scmp.lt.s32.totalorder %s417_s20, %s410_s13 }
  0x25   : > { %p414_p12 = pneg %p413_p4  ;;  %p420_p8 = por %p419_p5, %p418_p11 }
  0x27   : > { %p421_p9 = pnand %p420_p8, %p414_p12 }
  0x29   : > { %424 = shalt.err (!%p421_p9)
}
  0x2a   : > { %352 = dma.hbm_to_vmem [thread:$0]  (!%p575_p13), %s571_s25, 128, %s579_s27, %s88_s29  }
  0x2b   : > { %p678_p0 = scmp.lt.s32.totalorder %s491_s9, 3  ;;  %p679_p1 = scmp.ge.s32.totalorder %s491_s9, 1 }
  0x2d   : > { %p105_p3 = pnand %p679_p1, %p678_p0 }
  0x2e   : > { %s613_s21 = sand.u32 (!%p105_p3), 1, %s483_s7  }
  0x2f   : > { %108 = sbr.rel (%p105_p3) target bundleno = 217 (0xd9), region = 24  ;;  %s335_s22 = sshll.u32 (!%p105_p3), %s613_s21, 3 }
  0x30   : > { %s111_s23 = scalar_lea.sflag (!%p105_p3), [#allocation3], %s613_s21  ;;  %s114_s24 = scalar_lea.vmem (!%p105_p3), [#allocation2], %s335_s22 }
  0x36   : > { %470 = dma.done.wait (%p551_p6), %s111_s23, 128  }
  0x37   : > { %472 = vsyncadd (%p551_p6), %s111_s23, 4294967168  ;;  %v133_v0 = vld [vmem:[%s114_s24] sm:$0xff]  ;;  %s494_s25 = smov 16   ;;  %s495_s26 = smov 1   ;;  %v141_v2 = vlaneseq  ;;  %vm167_vm2 = vcmask 1043456  }
  0x38   : > { %151 = vrot.lane.b32.xlu1 %v133_v0, %s494_s25  ;;  %137 = vrot.lane.b32.xlu0 %v133_v0, %s495_s26  ;;  %v135_v1 = vcombine.high %v133_v0, %v133_v0  ;;  %v496_v30 = vmov 1966171168   ;;  %s336_s17 = sshll.u32 %s613_s21, 2  ;;  %s344_s27 = sshll.u32 %s529_s10, 6 }
  0x39   : > { %v142_v3 = vand.u32 127, %v141_v2  ;;  %v186_v31 = vunpack.c.l.s4 %v496_v30  ;;  %v189_v41 = vshrl.u32 %v141_v2, 7  ;;  %s132_s28 = scalar_lea.vmem [#allocation5], %s336_s17  ;;  %vm202_vm3 = vcmp.lt.s32.totalorder %v141_v2, 256  ;;  %s626_s3 = scalar_lea.hbm %s671_s1, %s344_s27 }
  0x3a   : > { %s258_s29 = sshll.u32 %s132_s28, 4  ;;  %s244_s10 = scalar_lea.sflag [#allocation4], %s613_s21  ;;  %s628_s29 = int_to_ptr.vmem [resolvable:$true] %s258_s29 }
  0x3b   : > { %vm155_vm0 = vcmp.lt.s32.totalorder %v142_v3, 16  ;;  %vm143_vm1 = vcmp.lt.s32.totalorder %v142_v3, 1  ;;  %v187_v40 = vunpack.c.0.s8 %v186_v31  ;;  %s425_s4 = scalar_lea.vmem %s628_s29, 64  ;;  %p680_p11 = scmp.ne.s32.totalorder %s675_s18, 0 }
  0x3c   : > { %153 = vrot.lane.b32.xlu1 %v135_v1, %s494_s25  ;;  %139 = vrot.lane.b32.xlu0 %v135_v1, %s495_s26  ;;  %p426_p6 = scmp.ne.s32.totalorder %s628_s29, %s425_s4  ;;  %s497_s5 = smov [#allocation5]  }
  0x3d   : > { %v190_v48 = vsub.s32 %v187_v40, %v189_v41  ;;  %s429_s11 = sshll.u32 %s497_s5, 4  ;;  %s430_s11 = int_to_ptr.vmem [resolvable:$false] %s429_s11 }
  0x3e   : > { %p427_p12 = pnand %p426_p6, %p680_p11  ;;  %s431_s13 = scalar_lea.vmem %s430_s11, 128 }
  0x3f   : > { %p432_p7 = scmp.lt.s32.totalorder %s628_s29, %s430_s11  ;;  %p433_p10 = scmp.lt.s32.totalorder %s431_s13, %s425_s4 }
  0x40   : > { %p428_p13 = pneg %p427_p12 }
  0x41   : > { %p434_p2 = por %p433_p10, %p432_p7 }
  0x43   : > { %p435_p4 = pnand %p434_p2, %p428_p13 }
  0xaa   : > { %v152_v4 = vpop.permute.xlu1 %151  ;;  %v138_v5 = vpop.permute.xlu0 %137 }
  0xae   : > { %v154_v6 = vpop.permute.xlu1 %153  ;;  %v140_v7 = vpop.permute.xlu0 %139 }
  0xaf   : > { %v156_v8 = vsel %vm155_vm0, %v152_v4, %v154_v6  ;;  %v157_v9 = vsel %vm155_vm0, %v154_v6, %v152_v4  ;;  %v144_v10 = vsel %vm143_vm1, %v138_v5, %v140_v7  ;;  %v145_v11 = vsel %vm143_vm1, %v140_v7, %v138_v5 }
  0xb0   : > { %v160_v12 = vcombine.low %v157_v9, %v156_v8  ;;  %v148_v13 = vcombine.low %v145_v11, %v144_v10 }
  0xb2   : > { %v162_v14 = vsub.f32 %v133_v0, %v160_v12  ;;  %v150_v15 = vsub.f32 %v133_v0, %v148_v13 }
  0xb4   : > { %v163_v16 = vmul.f32 %v162_v14, %v162_v14  ;;  %v205_v17 = vmul.f32 %v150_v15, %v150_v15 }
  0xb6   : > { %v165_v18 = vcombine.high %v163_v16, %v163_v16  ;;  %v168_v19 = vsel %vm167_vm2, %v163_v16, 0.0  ;;  %v207_v20 = vcombine.high %v205_v17, %v205_v17  ;;  %v209_v21 = vsel %vm167_vm2, %v205_v17, 0.0 }
  0xb7   : > { %v169_v22 = vrot.slane %v168_v19, 4  ;;  %v210_v23 = vrot.slane %v209_v21, 4 }
  0xb8   : > { %v175_v24 = vsel %vm167_vm2, %v165_v18, 0.0  ;;  %v216_v25 = vsel %vm167_vm2, %v207_v20, 0.0 }
  0xb9   : > { %v170_v26 = vadd.f32 %v169_v22, %v168_v19  ;;  %v176_v27 = vrot.slane %v175_v24, 4  ;;  %v211_v28 = vadd.f32 %v210_v23, %v209_v21  ;;  %v217_v29 = vrot.slane %v216_v25, 4 }
  0xbb   : > { %v171_v32 = vrot.slane %v170_v26, 2  ;;  %v177_v33 = vadd.f32 %v176_v27, %v175_v24  ;;  %v212_v34 = vrot.slane %v211_v28, 2  ;;  %v218_v35 = vadd.f32 %v217_v29, %v216_v25 }
  0xbd   : > { %v172_v36 = vadd.f32 %v171_v32, %v170_v26  ;;  %v178_v37 = vrot.slane %v177_v33, 2  ;;  %v213_v38 = vadd.f32 %v212_v34, %v211_v28  ;;  %v219_v39 = vrot.slane %v218_v35, 2 }
  0xbf   : > { %v173_v42 = vrot.slane %v172_v36, 1  ;;  %v179_v43 = vadd.f32 %v178_v37, %v177_v33  ;;  %v214_v44 = vrot.slane %v213_v38, 1  ;;  %v220_v45 = vadd.f32 %v219_v39, %v218_v35 }
  0xc1   : > { %v180_v46 = vrot.slane %v179_v43, 1  ;;  %v221_v47 = vrot.slane %v220_v45, 1  ;;  %v174_v49 = vadd.f32 %v173_v42, %v172_v36  ;;  %v215_v51 = vadd.f32 %v214_v44, %v213_v38 }
  0xc3   : > { %v181_v50 = vadd.f32 %v180_v46, %v179_v43  ;;  %v222_v52 = vadd.f32 %v221_v47, %v220_v45 }
  0xc5   : > { %v184_v53 = vcombine.low %v174_v49, %v181_v50  ;;  %v225_v54 = vcombine.low %v215_v51, %v222_v52 }
  0xc7   : > { %v191_v55 = vrot.slane %v184_v53, %v190_v48  ;;  %v232_v56 = vrot.slane %v225_v54, %v190_v48 }
  0xc9   : > { %v198_v57 = vrot.slane %v191_v55, %v190_v48  ;;  %v239_v58 = vrot.slane %v232_v56, %v190_v48 }
  0xcb   : > { %204 = vst.msk [vmem:[%s132_s28] ss:$2 sm:$0x3] %vm202_vm3, %v198_v57  ;;  %337 = vst.msk [vmem:[%s132_s28 + $0x1] ss:$2 sm:$0x3] %vm202_vm3, %v239_v58 }
  0xcc   : > { %438 = shalt.err (!%p435_p4)
}
  0xcd   : > { %s439_s14 = scalar_lea.hbm %s626_s3, 64  ;;  %s443_s21 = scalar_lea.hbm %s671_s1, 128 }
  0xce   : > { %p440_p5 = scmp.ne.s32.totalorder %s626_s3, %s439_s14  ;;  %p444_p0 = scmp.lt.u32.totalorder %s626_s3, %s671_s1 }
  0xcf   : > { %p445_p1 = scmp.lt.u32.totalorder %s443_s21, %s439_s14  ;;  %p447_p6 = scmp.lt.u32.totalorder %s439_s14, %s626_s3 }
  0xd0   : > { %p441_p8 = pnand %p440_p5, %p680_p11 }
  0xd1   : > { %p446_p3 = por %p445_p1, %p444_p0 }
  0xd2   : > { %p442_p9 = pneg %p441_p8 }
  0xd3   : > { %p448_p12 = por %p447_p6, %p446_p3 }
  0xd5   : > { %p449_p13 = pnand %p448_p12, %p442_p9 }
  0xd7   : > { %452 = shalt.err (!%p449_p13)
}
  0xd8   : > { %347 = dma.vmem_to_hbm [thread:$0]  (%p680_p11), %s628_s29, 64, %s626_s3, %s244_s10  }
  0xd9 PF: > { %s270_s24 = sand.u32 1, %s479_s6   ;;  %p681_p7 = scmp.ne.s32.totalorder %s676_s19, 0 }
  0xda   : > { %p682_p10 = scmp.ge.s32.totalorder %s491_s9, 2  ;;  %s271_s25 = scalar_lea.sflag [#allocation4], %s270_s24 }
  0xdc   : > { %p354_p2 = pnand %p682_p10, %p681_p7 }
  0xde   : > { %474 = dma.done.wait (!%p354_p2), %s271_s25, 64  }
  0xdf   : > { %476 = vsyncadd (!%p354_p2), %s271_s25, 4294967232  ;;  %p14_p4 = scmp.ge.s32.totalorder %s533_s12, 4   ;;  %s683_s6 = smov %s483_s7 }
  0xe0   : > { %s684_s7 = smov %s487_s8  ;;  %s685_s8 = smov %s545_s15 }
  0xe1   : > { %s686_s9 = smov %s533_s12  ;;  %16 = sbr.rel (!%p14_p4) target bundleno = 5 (0x5), region = 70 }
  0xe8   :  { %276 = vsyncpa [#allocation3], 1 }
  0xe9   :  { %278 = vsyncpa [#allocation3 + $0x1], 1 }
  0xea   :  { %279 = vsyncpa [#allocation4], 1 }
  0xeb   :  { %281 = vsyncpa [#allocation4 + $0x1], 1 }

</bundles_post_ra>
